<compile_context>
chip_gen: v7x
topology: tpu7x:2x2x1
jax: 0.10.0
libtpu: 0.0.40
codegen_flags: <defaults>
</compile_context>

<pallas_src>
import jax
import jax.numpy as jnp
from jax.experimental import pallas as pl
from jax.experimental.pallas import tpu as pltpu

TABULAR_FEATURES = 6   # ['Age','Gender','Height','Weight','ICUType','Outcome']
COND_FEATURES = 3      # ['Age','Gender','disease_label']
IN_DIM = TABULAR_FEATURES + COND_FEATURES   # 9
H1, H2, OUT = 128, 64, 1

DEFAULT_TILE_B = 4096  # rows per grid step (lane axis); ~4 MiB VMEM per tile


def _round_up(n, m):
    return ((n + m - 1) // m) * m


def _mlp_kernel(xc_ref, w1t_ref, b1_ref, w2t_ref, b2_ref, w3_ref, b3_ref, o_ref):
    # All activations are feature-major: features on sublanes, batch on lanes.
    # Layer 1: (128, 9) @ (9, TB) -> (128, TB), bias column broadcast over lanes.
    h1 = jnp.dot(w1t_ref[...], xc_ref[...], preferred_element_type=jnp.float32)
    h1 = jnp.maximum(h1 + b1_ref[...], 0.0)                       # ReLU

    # Layer 2: (64, 128) @ (128, TB) -> (64, TB).
    h2 = jnp.dot(w2t_ref[...], h1, preferred_element_type=jnp.float32)
    h2 = jnp.maximum(h2 + b2_ref[...], 0.0)                       # ReLU

    # Layer 3: (1, 64) @ (64, TB) -> (1, TB); bias (1,1) broadcasts over lanes.
    z = jnp.dot(w3_ref[...], h2, preferred_element_type=jnp.float32) + b3_ref[...]

    # Exact sigmoid (EUP exp + f32 divide); lane-dense store.
    o_ref[...] = 1.0 / (1.0 + jnp.exp(-z))


def _choose_tile_b(batch, tile_b):
    # Multiple of 128 (lane-dense blocks, satisfies the (8,128) rule), and capped so
    # the grid has >=2 steps whenever the batch allows it (keeps both v7x TCs busy).
    tile_b = _round_up(max(int(tile_b), 1), 128)
    tile_b = min(tile_b, _round_up(max(batch // 2, 1), 128))
    return tile_b


def tabular_discriminator(x, cond, params, *, tile_b=DEFAULT_TILE_B):
    """x: (B, 6) f32, cond: (B, 3) f32 -> (B, 1) f32 in (0, 1)."""
    w1, b1, w2, b2, w3, b3 = params
    B = x.shape[0]

    # Feature-major operands: concat once in the wrapper, transpose weights.
    xc_t = jnp.concatenate([x, cond], axis=1).T        # (9, B)   lane-dense batch
    w1_t = w1.T                                        # (128, 9)
    b1_c = jnp.reshape(b1, (H1, 1))                    # (128, 1)
    w2_t = w2.T                                        # (64, 128)
    b2_c = jnp.reshape(b2, (H2, 1))                    # (64, 1)
    w3_r = jnp.reshape(w3, (1, H2))                    # (1, 64)
    b3_m = jnp.reshape(b3, (1, 1))                     # (1, 1)

    tile_b = _choose_tile_b(B, tile_b)
    b_pad = _round_up(B, tile_b)
    if b_pad != B:
        xc_t = jnp.pad(xc_t, ((0, 0), (0, b_pad - B)))
    grid = (b_pad // tile_b,)

    resident = lambda a: pl.BlockSpec(a.shape, lambda i: (0, 0))   # VMEM-resident

    out = pl.pallas_call(
        _mlp_kernel,
        out_shape=jax.ShapeDtypeStruct((1, b_pad), jnp.float32),
        grid_spec=pltpu.PrefetchScalarGridSpec(
            num_scalar_prefetch=0,
            grid=grid,
            in_specs=[
                pl.BlockSpec((IN_DIM, tile_b), lambda i: (0, i)),  # xcT batch tile
                resident(w1_t), resident(b1_c),
                resident(w2_t), resident(b2_c),
                resident(w3_r), resident(b3_m),
            ],
            out_specs=pl.BlockSpec((1, tile_b), lambda i: (0, i)),  # lane-dense output
        ),
        compiler_params=pltpu.CompilerParams(
            dimension_semantics=("parallel",),        # megacore split on v7x
            vmem_limit_bytes=32 * 1024 * 1024,        # explicit scoped-VMEM budget
        ),
    )(xc_t, w1_t, b1_c, w2_t, b2_c, w3_r, b3_m)

    return jnp.reshape(out[0, :B], (B, OUT))


def init_params(key):
    """Deterministic init mimicking nn.Linear defaults (uniform +-1/sqrt(fan_in))."""
    ks = jax.random.split(key, 6)

    def linear(kw, kb, fan_in, fan_out):
        bound = 1.0 / jnp.sqrt(float(fan_in))
        w = jax.random.uniform(kw, (fan_in, fan_out), jnp.float32, -bound, bound)
        b = jax.random.uniform(kb, (1, fan_out), jnp.float32, -bound, bound)
        return w, b

    w1, b1 = linear(ks[0], ks[1], IN_DIM, H1)
    w2, b2 = linear(ks[2], ks[3], H1, H2)
    w3, b3 = linear(ks[4], ks[5], H2, OUT)
    return (w1, b1, w2, b2, w3, b3)


def _reference(x, cond, params):
    # HIGHEST precision so the f32 reference matmuls are not silently done in bf16.
    w1, b1, w2, b2, w3, b3 = params
    hp = jax.lax.Precision.HIGHEST
    xc = jnp.concatenate([x, cond], axis=1)
    h1 = jnp.maximum(jnp.dot(xc, w1, precision=hp) + b1, 0.0)
    h2 = jnp.maximum(jnp.dot(h1, w2, precision=hp) + b2, 0.0)
    z = jnp.dot(h2, w3, precision=hp) + b3
    return 1.0 / (1.0 + jnp.exp(-z))


if __name__ == "__main__":
    key = jax.random.PRNGKey(0)
    k_x, k_c, k_p = jax.random.split(key, 3)
    params = init_params(k_p)

    # Small single-tile case.
    B = 16
    x = jax.random.normal(k_x, (B, TABULAR_FEATURES), jnp.float32)
    cond = jax.random.normal(k_c, (B, COND_FEATURES), jnp.float32)
    out = jax.block_until_ready(tabular_discriminator(x, cond, params))
    ref = _reference(x, cond, params)
    assert out.shape == (B, OUT)
    assert bool(jnp.all(jnp.isfinite(out)))
    # 5e-3 absolute on a (0,1) probability: generous enough for any MXU f32
    # decomposition differences, tight enough to catch real wiring bugs.
    assert jnp.allclose(out, ref, atol=5e-3, rtol=0.0), "mismatch vs reference (B=16)"

    # Multi-tile case exercising the batch grid (3 steps) + lane padding path.
    B2 = 300
    x2 = jax.random.normal(jax.random.PRNGKey(1), (B2, TABULAR_FEATURES), jnp.float32)
    c2 = jax.random.normal(jax.random.PRNGKey(2), (B2, COND_FEATURES), jnp.float32)
    out2 = jax.block_until_ready(
        tabular_discriminator(x2, c2, params, tile_b=128))
    ref2 = _reference(x2, c2, params)
    assert out2.shape == (B2, OUT)
    assert jnp.allclose(out2, ref2, atol=5e-3, rtol=0.0), "mismatch vs reference (B=300)"

    print("KERNEL_OK")
</pallas_src>

<mosaic_0001>
module attributes {stable_mosaic.version = 11 : i64} {
  func.func @_mlp_kernel(%arg0: i32, %arg1: memref<9x128xf32, #tpu.memory_space<vmem>>, %arg2: memref<128x9xf32, #tpu.memory_space<vmem>>, %arg3: memref<128x1xf32, #tpu.memory_space<vmem>>, %arg4: memref<64x128xf32, #tpu.memory_space<vmem>>, %arg5: memref<64x1xf32, #tpu.memory_space<vmem>>, %arg6: memref<1x64xf32, #tpu.memory_space<vmem>>, %arg7: memref<1x1xf32, #tpu.memory_space<vmem>>, %arg8: memref<1x128xf32, #tpu.memory_space<vmem>>) attributes {dimension_semantics = [#tpu.dimension_semantics<parallel>], iteration_bounds = array<i64: 1>, scalar_prefetch = 0 : i64, scratch_operands = 0 : i64, tpu.core_type = #tpu.core_type<tc>, window_params = [{transform_indices = @transform_0, window_bounds = array<i64: 9, 128>}, {pipeline_mode = #tpu.pipeline_mode<synchronous>, transform_indices = @transform_1, window_bounds = array<i64: 128, 9>}, {pipeline_mode = #tpu.pipeline_mode<synchronous>, transform_indices = @transform_2, window_bounds = array<i64: 128, 1>}, {pipeline_mode = #tpu.pipeline_mode<synchronous>, transform_indices = @transform_3, window_bounds = array<i64: 64, 128>}, {pipeline_mode = #tpu.pipeline_mode<synchronous>, transform_indices = @transform_4, window_bounds = array<i64: 64, 1>}, {pipeline_mode = #tpu.pipeline_mode<synchronous>, transform_indices = @transform_5, window_bounds = array<i64: 1, 64>}, {pipeline_mode = #tpu.pipeline_mode<synchronous>, transform_indices = @transform_6, window_bounds = array<i64: 1, 1>}, {transform_indices = @transform_7, window_bounds = array<i64: 1, 128>}]} {
    %c0 = arith.constant 0 : index
    %c0_0 = arith.constant 0 : index
    %0 = vector.load %arg2[%c0, %c0_0] : memref<128x9xf32, #tpu.memory_space<vmem>>, vector<128x9xf32>
    %c0_1 = arith.constant 0 : index
    %c0_2 = arith.constant 0 : index
    %1 = vector.load %arg1[%c0_1, %c0_2] : memref<9x128xf32, #tpu.memory_space<vmem>>, vector<9x128xf32>
    %cst = arith.constant dense<0.000000e+00> : vector<128x128xf32>
    %2 = tpu.matmul %0, %1, %cst {dimension_numbers = #tpu.dot_dimension_numbers<[1], [0], [0], [1], [0, 0, 1, 1], [], []>} : vector<128x9xf32>, vector<9x128xf32>, vector<128x128xf32> -> vector<128x128xf32>
    %c0_3 = arith.constant 0 : index
    %c0_4 = arith.constant 0 : index
    %3 = vector.load %arg3[%c0_3, %c0_4] : memref<128x1xf32, #tpu.memory_space<vmem>>, vector<128x1xf32>
    %4 = vector.broadcast %3 : vector<128x1xf32> to vector<128x128xf32>
    %5 = arith.addf %2, %4 : vector<128x128xf32>
    %cst_5 = arith.constant 0.000000e+00 : f32
    %6 = vector.broadcast %cst_5 : f32 to vector<128x128xf32>
    %7 = arith.maximumf %5, %6 : vector<128x128xf32>
    %c0_6 = arith.constant 0 : index
    %c0_7 = arith.constant 0 : index
    %8 = vector.load %arg4[%c0_6, %c0_7] : memref<64x128xf32, #tpu.memory_space<vmem>>, vector<64x128xf32>
    %cst_8 = arith.constant dense<0.000000e+00> : vector<64x128xf32>
    %9 = tpu.matmul %8, %7, %cst_8 {dimension_numbers = #tpu.dot_dimension_numbers<[1], [0], [0], [1], [0, 0, 1, 1], [], []>} : vector<64x128xf32>, vector<128x128xf32>, vector<64x128xf32> -> vector<64x128xf32>
    %c0_9 = arith.constant 0 : index
    %c0_10 = arith.constant 0 : index
    %10 = vector.load %arg5[%c0_9, %c0_10] : memref<64x1xf32, #tpu.memory_space<vmem>>, vector<64x1xf32>
    %11 = vector.broadcast %10 : vector<64x1xf32> to vector<64x128xf32>
    %12 = arith.addf %9, %11 : vector<64x128xf32>
    %cst_11 = arith.constant 0.000000e+00 : f32
    %13 = vector.broadcast %cst_11 : f32 to vector<64x128xf32>
    %14 = arith.maximumf %12, %13 : vector<64x128xf32>
    %c0_12 = arith.constant 0 : index
    %c0_13 = arith.constant 0 : index
    %15 = vector.load %arg6[%c0_12, %c0_13] : memref<1x64xf32, #tpu.memory_space<vmem>>, vector<1x64xf32>
    %cst_14 = arith.constant dense<0.000000e+00> : vector<1x128xf32>
    %16 = tpu.matmul %15, %14, %cst_14 {dimension_numbers = #tpu.dot_dimension_numbers<[1], [0], [0], [1], [0, 0, 1, 1], [], []>} : vector<1x64xf32>, vector<64x128xf32>, vector<1x128xf32> -> vector<1x128xf32>
    %c0_15 = arith.constant 0 : index
    %c0_16 = arith.constant 0 : index
    %17 = vector.load %arg7[%c0_15, %c0_16] : memref<1x1xf32, #tpu.memory_space<vmem>>, vector<1x1xf32>
    %18 = vector.broadcast %17 : vector<1x1xf32> to vector<1x128xf32>
    %19 = arith.addf %16, %18 : vector<1x128xf32>
    %cst_17 = arith.constant 0.000000e+00 : f32
    %20 = vector.broadcast %cst_17 : f32 to vector<1x128xf32>
    %21 = arith.subf %20, %19 : vector<1x128xf32>
    %22 = math.exp %21 : vector<1x128xf32>
    %cst_18 = arith.constant 1.000000e+00 : f32
    %23 = vector.broadcast %cst_18 : f32 to vector<1x128xf32>
    %24 = arith.addf %23, %22 : vector<1x128xf32>
    %cst_19 = arith.constant 1.000000e+00 : f32
    %25 = vector.broadcast %cst_19 : f32 to vector<1x128xf32>
    %26 = arith.divf %25, %24 : vector<1x128xf32>
    %c0_20 = arith.constant 0 : index
    %c0_21 = arith.constant 0 : index
    %27 = vector.load %arg8[%c0_20, %c0_21] : memref<1x128xf32, #tpu.memory_space<vmem>>, vector<1x128xf32>
    tpu.vector_store %arg8[%c0_20, %c0_21], %26 {strides = array<i32>} : memref<1x128xf32, #tpu.memory_space<vmem>>, vector<1x128xf32>,
    return
  }
  func.func @transform_0(%arg0: i32) -> (i32, i32) {
    %c0_i32 = arith.constant 0 : i32
    %c0_i32_0 = arith.constant 0 : i32
    return %c0_i32, %arg0 : i32, i32
  }
  func.func @transform_1(%arg0: i32) -> (i32, i32) {
    %c0_i32 = arith.constant 0 : i32
    %c0_i32_0 = arith.constant 0 : i32
    %c0_i32_1 = arith.constant 0 : i32
    return %c0_i32, %c0_i32_0 : i32, i32
  }
  func.func @transform_2(%arg0: i32) -> (i32, i32) {
    %c0_i32 = arith.constant 0 : i32
    %c0_i32_0 = arith.constant 0 : i32
    %c0_i32_1 = arith.constant 0 : i32
    return %c0_i32, %c0_i32_0 : i32, i32
  }
  func.func @transform_3(%arg0: i32) -> (i32, i32) {
    %c0_i32 = arith.constant 0 : i32
    %c0_i32_0 = arith.constant 0 : i32
    %c0_i32_1 = arith.constant 0 : i32
    return %c0_i32, %c0_i32_0 : i32, i32
  }
  func.func @transform_4(%arg0: i32) -> (i32, i32) {
    %c0_i32 = arith.constant 0 : i32
    %c0_i32_0 = arith.constant 0 : i32
    %c0_i32_1 = arith.constant 0 : i32
    return %c0_i32, %c0_i32_0 : i32, i32
  }
  func.func @transform_5(%arg0: i32) -> (i32, i32) {
    %c0_i32 = arith.constant 0 : i32
    %c0_i32_0 = arith.constant 0 : i32
    %c0_i32_1 = arith.constant 0 : i32
    return %c0_i32, %c0_i32_0 : i32, i32
  }
  func.func @transform_6(%arg0: i32) -> (i32, i32) {
    %c0_i32 = arith.constant 0 : i32
    %c0_i32_0 = arith.constant 0 : i32
    %c0_i32_1 = arith.constant 0 : i32
    return %c0_i32, %c0_i32_0 : i32, i32
  }
  func.func @transform_7(%arg0: i32) -> (i32, i32) {
    %c0_i32 = arith.constant 0 : i32
    %c0_i32_0 = arith.constant 0 : i32
    return %c0_i32, %arg0 : i32, i32
  }
}

</mosaic_0001>

<bundles_post_ra>
// kernel: tpu_custom_call.1
= control target key start
LH: loop header
LB: loop body
LE: loop exit
PB: predicated region body
PF: predicated region fallthrough
CT: control target
= control target key end

     0   :  { %s1108_s0 = inlined_call_operand.vmem [shape: f32[9,128], index: 0, kind: input, shape index: {}]   ;;  %s1109_s1 = inlined_call_operand.vmem [shape: f32[128,9], index: 1, kind: input, shape index: {}]   ;;  %s1110_s2 = inlined_call_operand.vmem [shape: f32[128,1], index: 2, kind: input, shape index: {}]   ;;  %s1111_s3 = inlined_call_operand.vmem [shape: f32[64,128], index: 3, kind: input, shape index: {}]   ;;  %s1112_s4 = inlined_call_operand.vmem [shape: f32[64,1], index: 4, kind: input, shape index: {}]   ;;  %s1113_s5 = inlined_call_operand.vmem [shape: f32[1,64], index: 5, kind: input, shape index: {}]   ;;  %s1114_s6 = inlined_call_operand.<no memory space> [shape: f32[1,1], index: 6, kind: input, shape index: {}]   ;;  %s1115_s7 = inlined_call_operand.hbm [shape: f32[1,128], index: 7, kind: output, shape index: {}]  }
   0x1   :  { %v12_v0 = vstv %s1114_s6 }
   0x2   :  { %13 = vst [vmem:[#allocation2] sm:$0x1] %v12_v0 }
   0x3   :  { %v45_v1 = vld [vmem:[%s1108_s0] sm:$0xff]  ;;  %v46_v2 = vld [vmem:[%s1108_s0 + $0x8] sm:$0x1]  ;;  %vm192_vm0 = vcmask 1040384   ;;  %vm878_vm1 = vmmov 1   ;;  %vm143_vm3 = vcmask 72704  }
   0x4   :  { %v29_v3 = vld [vmem:[%s1109_s1] sm:$0xff]  ;;  %v792_v4 = vpack.c.bf16 %v46_v2, %v45_v1  ;;  %vm793_vm2 = vmpackc.low %vm192_vm0, %vm878_vm1  ;;  %v879_v5 = vmov 0   ;;  %v30_v6 = vld [vmem:[%s1109_s1 + $0x8] sm:$0xff] }
   0x5   :  { %705 = vmatprep.mubr.msk.f32.mxu0 %vm143_vm3, %v29_v3  ;;  %848 = vset.pattern.permute.xlu0 %v879_v5  ;;  %v31_v7 = vld [vmem:[%s1109_s1 + $0x10] sm:$0xff]  ;;  %v47_v8 = vld [vmem:[%s1110_s2] sm:$0xff]  ;;  %v32_v10 = vld [vmem:[%s1109_s1 + $0x18] sm:$0xff] }
   0x6   :  { %794 = vmatprep.subr.msk.bf16.mxu0 %vm793_vm2, %v792_v4  ;;  %849 = vset.pattern.permute.xlu1 %v879_v5  ;;  %v49_v9 = vld [vmem:[%s1110_s2 + $0x10] sm:$0xff]  ;;  %v48_v11 = vld [vmem:[%s1110_s2 + $0x8] sm:$0xff]  ;;  %v33_v12 = vld [vmem:[%s1109_s1 + $0x20] sm:$0xff] }
   0x7   :  { %797 = vmatpush3.bf16.msk.msra.mxu0 %vm793_vm2, %v792_v4  ;;  %65 = vperm.xlu0 %848, %v47_v8   ;;  %v50_v13 = vld [vmem:[%s1110_s2 + $0x18] sm:$0xff]  ;;  %v34_v14 = vld [vmem:[%s1109_s1 + $0x28] sm:$0xff]  ;;  %v51_v15 = vld [vmem:[%s1110_s2 + $0x20] sm:$0xff] }
   0x8   :  { %75 = vperm.xlu1 %849, %v49_v9   ;;  %v35_v16 = vld [vmem:[%s1109_s1 + $0x30] sm:$0xff]  ;;  %v52_v17 = vld [vmem:[%s1110_s2 + $0x28] sm:$0xff] }
   0xa   :  { %706 = vmatmul.mubr.msk.f32.vlgmr.msra.gmra.mrb[0].mxu0 %vm143_vm3, %v30_v6 }
   0xb   :  { %708 = vmatprep.mubr.msk.f32.mxu0 %vm143_vm3, %v31_v7  ;;  %70 = vperm.xlu0 %848, %v48_v11  }
   0xc   :  { %80 = vperm.xlu1 %849, %v50_v13  }
   0xe   :  { %709 = vmatmul.mubr.msk.f32.gmra.mrb[2].mxu0 %vm143_vm3, %v32_v10 }
   0xf   :  { %711 = vmatprep.mubr.msk.f32.mxu0 %vm143_vm3, %v33_v12 }
  0x10   :  { %14 = vsyncpa [#allocation4], 0  ;;  %85 = vperm.xlu0 %848, %v51_v15   ;;  %v36_v18 = vld [vmem:[%s1109_s1 + $0x38] sm:$0xff]  ;;  %v53_v19 = vld [vmem:[%s1110_s2 + $0x30] sm:$0xff]  ;;  %90 = vperm.xlu1 %849, %v52_v17   ;;  %vm881_vm4 = vmmov 0   ;;  %vm537_vm5 = vcmask 523264  }
  0x11   :  { %v37_v20 = vld [vmem:[%s1109_s1 + $0x40] sm:$0xff]  ;;  %v54_v21 = vld [vmem:[%s1110_s2 + $0x38] sm:$0xff]  ;;  %v38_v22 = vld [vmem:[%s1109_s1 + $0x48] sm:$0xff]  ;;  %s883_s23 = smov [#allocation3]  }
  0x12   :  { %712 = vmatmul.mubr.msk.f32.gmra.mrb[4].mxu0 %vm143_vm3, %v34_v14  ;;  %v55_v23 = vld [vmem:[%s1110_s2 + $0x40] sm:$0xff]  ;;  %v39_v24 = vld [vmem:[%s1109_s1 + $0x50] sm:$0xff]  ;;  %v56_v25 = vld [vmem:[%s1110_s2 + $0x48] sm:$0xff]  ;;  %s624_s24 = sshll.u32 %s883_s23, 4  ;;  %s625_s24 = int_to_ptr.vmem [resolvable:$true] %s624_s24 }
  0x13   :  { %714 = vmatprep.mubr.msk.f32.mxu0 %vm143_vm3, %v35_v16  ;;  %v40_v26 = vld [vmem:[%s1109_s1 + $0x58] sm:$0xff]  ;;  %v57_v27 = vld [vmem:[%s1110_s2 + $0x50] sm:$0xff]  ;;  %v41_v28 = vld [vmem:[%s1109_s1 + $0x60] sm:$0xff]  ;;  %p859_p1 = scmp.lt.s32.totalorder %s625_s24, %s625_s24 }
  0x14   :  { %95 = vperm.xlu0 %848, %v53_v19   ;;  %100 = vperm.xlu1 %849, %v54_v21   ;;  %v58_v29 = vld [vmem:[%s1110_s2 + $0x58] sm:$0xff]  ;;  %v42_v30 = vld [vmem:[%s1109_s1 + $0x68] sm:$0xff]  ;;  %v59_v31 = vld [vmem:[%s1110_s2 + $0x60] sm:$0xff] }
  0x15   :  { %v43_v32 = vld [vmem:[%s1109_s1 + $0x70] sm:$0xff]  ;;  %v60_v33 = vld [vmem:[%s1110_s2 + $0x68] sm:$0xff]  ;;  %v44_v34 = vld [vmem:[%s1109_s1 + $0x78] sm:$0xff] }
  0x16   :  { %715 = vmatmul.mubr.msk.f32.gmra.mrb[6].mxu0 %vm143_vm3, %v36_v18  ;;  %v61_v35 = vld [vmem:[%s1110_s2 + $0x70] sm:$0xff]  ;;  %v62_v36 = vld [vmem:[%s1110_s2 + $0x78] sm:$0xff]  ;;  %v365_v37 = vld [vmem:[%s1112_s4] sm:$0xff]  ;;  %s858_s2 = scalar_lea.vmem %s625_s24, 32 }
  0x17   :  { %717 = vmatprep.mubr.msk.f32.mxu0 %vm143_vm3, %v37_v20  ;;  %v366_v38 = vld [vmem:[%s1112_s4 + $0x8] sm:$0xff]  ;;  %v367_v39 = vld [vmem:[%s1112_s4 + $0x10] sm:$0xff]  ;;  %v368_v40 = vld [vmem:[%s1112_s4 + $0x18] sm:$0xff] }
  0x18   :  { %105 = vperm.xlu0 %848, %v55_v23   ;;  %110 = vperm.xlu1 %849, %v56_v25   ;;  %v369_v41 = vld [vmem:[%s1112_s4 + $0x20] sm:$0xff]  ;;  %v370_v42 = vld [vmem:[%s1112_s4 + $0x28] sm:$0xff]  ;;  %v371_v43 = vld [vmem:[%s1112_s4 + $0x30] sm:$0xff] }
  0x19   :  { %v372_v44 = vld [vmem:[%s1112_s4 + $0x38] sm:$0xff]  ;;  %v527_v45 = vld [vmem:[#allocation2] sm:$0x1] }
  0x1a   :  { %718 = vmatmul.mubr.msk.f32.gmra.mrb[8].mxu0 %vm143_vm3, %v38_v22  ;;  %v357_v46 = vld [vmem:[%s1111_s3] sm:$0xff] }
  0x1b   :  { %720 = vmatprep.mubr.msk.f32.mxu0 %vm143_vm3, %v39_v24  ;;  %761 = vmatprep.mubr.f32.mxu1 %v357_v46 }
  0x1c   :  { %115 = vperm.xlu0 %848, %v57_v27   ;;  %120 = vperm.xlu1 %849, %v58_v29  }
  0x1e   :  { %721 = vmatmul.mubr.msk.f32.gmra.mrb[10].mxu0 %vm143_vm3, %v40_v26 }
  0x1f   :  { %723 = vmatprep.mubr.msk.f32.mxu0 %vm143_vm3, %v41_v28 }
  0x20   :  { %125 = vperm.xlu0 %848, %v59_v31   ;;  %130 = vperm.xlu1 %849, %v60_v33  }
  0x22   :  { %724 = vmatmul.mubr.msk.f32.gmra.mrb[12].mxu0 %vm143_vm3, %v42_v30 }
  0x23   :  { %726 = vmatprep.mubr.msk.f32.mxu0 %vm143_vm3, %v43_v32 }
  0x24   :  { %135 = vperm.xlu0 %848, %v61_v35   ;;  %140 = vperm.xlu1 %849, %v62_v36  }
  0x26   :  { %727 = vmatmul.mubr.msk.f32.gmra.mrb[14].mxu0 %vm143_vm3, %v44_v34 }
  0x28   :  { %375 = vperm.xlu0 %848, %v365_v37   ;;  %380 = vperm.xlu1 %849, %v366_v38  }
  0x2c   :  { %385 = vperm.xlu0 %848, %v367_v39   ;;  %390 = vperm.xlu1 %849, %v368_v40  }
  0x30   :  { %395 = vperm.xlu0 %848, %v369_v41   ;;  %400 = vperm.xlu1 %849, %v370_v42  }
  0x34   :  { %405 = vperm.xlu0 %848, %v371_v43   ;;  %410 = vperm.xlu1 %849, %v372_v44  }
  0x38   :  { %530 = vperm.xlu0 %848, %v527_v45  }
  0x86   :  { %v66_v48 = vpop.permute.xlu0 %65 }
  0x87   :  { %v76_v47 = vpop.permute.xlu1 %75 }
  0x8a   :  { %v71_v50 = vpop.permute.xlu0 %70 }
  0x8b   :  { %v81_v49 = vpop.permute.xlu1 %80 }
  0x8f   :  { %v91_v51 = vpop.permute.xlu1 %90  ;;  %v86_v52 = vpop.permute.xlu0 %85 }
  0x93   :  { %v101_v58 = vpop.permute.xlu1 %100  ;;  %v96_v61 = vpop.permute.xlu0 %95 }
  0x97   :  { %v111_v7 = vpop.permute.xlu1 %110  ;;  %v106_v10 = vpop.permute.xlu0 %105 }
  0x9b   :  { %v121_v19 = vpop.permute.xlu1 %120  ;;  %v116_v22 = vpop.permute.xlu0 %115 }
  0x9f   :  { %v131_v32 = vpop.permute.xlu1 %130  ;;  %v126_v35 = vpop.permute.xlu0 %125 }
  0xa3   :  { %v141_v44 = vpop.permute.xlu1 %140 }
  0xdd   :  { %v707_v53 = vpop.f32.mrb[0].mxu0 }
  0xde   :  { %v268_v54 = vadd.f32 %v707_v53, %v71_v50  ;;  %v262_v55 = vpop.f32.mrb[1].mxu0 }
  0xdf   :  { %v263_v56 = vadd.f32 %v262_v55, %v66_v48  ;;  %v358_v55 = vld [vmem:[%s1111_s3 + $0x8] sm:$0xff] }
  0xe0   :  { %v342_v57 = vmax.f32 %v268_v54, 0.0 }
  0xe1   :  { %v341_v59 = vmax.f32 %v263_v56, 0.0  ;;  %v710_v60 = vpop.f32.mrb[2].mxu0  ;;  %v359_v56 = vld [vmem:[%s1111_s3 + $0x10] sm:$0xff] }
  0xe2   :  { %v278_v62 = vadd.f32 %v710_v60, %v81_v49  ;;  %v272_v63 = vpop.f32.mrb[3].mxu0  ;;  %v363_v60 = vld [vmem:[%s1111_s3 + $0x30] sm:$0xff] }
  0xe3   :  { %v273_v0 = vadd.f32 %v272_v63, %v76_v47  ;;  %v798_v1 = vpack.c.bf16 %v342_v57, %v341_v59  ;;  %v136_v47 = vpop.permute.xlu0 %135  ;;  %v360_v57 = vld [vmem:[%s1111_s3 + $0x18] sm:$0xff]  ;;  %v362_v59 = vld [vmem:[%s1111_s3 + $0x28] sm:$0xff]  ;;  %v882_v63 = vmov 0.0  }
  0xe4   :  { %v344_v2 = vmax.f32 %v278_v62, 0.0  ;;  %v880_v62 = vmov 0.0|0.0   ;;  %789 = vmatprep.mubr.msk.f32.mxu0 %vm881_vm4, %v882_v63 }
  0xe5   :  { %v343_v3 = vmax.f32 %v273_v0, 0.0  ;;  %v713_v4 = vpop.f32.mrb[4].mxu0  ;;  %799 = vmatprep.subr.bf16.mxu1 %v798_v1  ;;  %830 = vmatprep.subr.bf16.mxu0 %v880_v62  ;;  %v381_v0 = vpop.permute.xlu1 %380 }
  0xe6   :  { %v288_v5 = vadd.f32 %v713_v4, %v91_v51  ;;  %v282_v6 = vpop.f32.mrb[5].mxu0  ;;  %801 = vmatpush3.bf16.msra.mxu1 %v798_v1 }
  0xe7   :  { %v802_v8 = vpack.c.bf16 %v344_v2, %v343_v3  ;;  %v283_v9 = vadd.f32 %v282_v6, %v86_v52  ;;  %v376_v1 = vpop.permute.xlu0 %375 }
  0xe8   :  { %v346_v11 = vmax.f32 %v288_v5, 0.0 }
  0xe9   :  { %v345_v12 = vmax.f32 %v283_v9, 0.0  ;;  %v716_v13 = vpop.f32.mrb[6].mxu0  ;;  %803 = vmatprep.subr.bf16.mxu1 %v802_v8  ;;  %v391_v2 = vpop.permute.xlu1 %390 }
  0xea   :  { %v298_v14 = vadd.f32 %v716_v13, %v101_v58  ;;  %v292_v15 = vpop.f32.mrb[7].mxu0  ;;  %805 = vmatpush3.bf16.msra.mxu1 %v802_v8  ;;  %v361_v58 = vld [vmem:[%s1111_s3 + $0x20] sm:$0xff] }
  0xeb   :  { %v806_v16 = vpack.c.bf16 %v346_v11, %v345_v12  ;;  %v293_v17 = vadd.f32 %v292_v15, %v96_v61  ;;  %v364_v61 = vld [vmem:[%s1111_s3 + $0x38] sm:$0xff]  ;;  %v386_v4 = vpop.permute.xlu0 %385 }
  0xec   :  { %v348_v18 = vmax.f32 %v298_v14, 0.0 }
  0xed   :  { %v347_v20 = vmax.f32 %v293_v17, 0.0  ;;  %v719_v21 = vpop.f32.mrb[8].mxu0  ;;  %807 = vmatprep.subr.bf16.mxu1 %v806_v16  ;;  %v401_v13 = vpop.permute.xlu1 %400 }
  0xee   :  { %v308_v23 = vadd.f32 %v719_v21, %v111_v7  ;;  %v302_v24 = vpop.f32.mrb[9].mxu0  ;;  %809 = vmatpush3.bf16.msra.mxu1 %v806_v16 }
  0xef   :  { %v810_v25 = vpack.c.bf16 %v348_v18, %v347_v20  ;;  %v303_v26 = vadd.f32 %v302_v24, %v106_v10  ;;  %v396_v16 = vpop.permute.xlu0 %395 }
  0xf0   :  { %v350_v27 = vmax.f32 %v308_v23, 0.0 }
  0xf1   :  { %v349_v28 = vmax.f32 %v303_v26, 0.0  ;;  %v722_v29 = vpop.f32.mrb[10].mxu0  ;;  %811 = vmatprep.subr.bf16.mxu1 %v810_v25 }
  0xf2   :  { %v318_v30 = vadd.f32 %v722_v29, %v121_v19  ;;  %v312_v31 = vpop.f32.mrb[11].mxu0  ;;  %813 = vmatpush3.bf16.msra.mxu1 %v810_v25  ;;  %v411_v25 = vpop.permute.xlu1 %410 }
  0xf3   :  { %v814_v33 = vpack.c.bf16 %v350_v27, %v349_v28  ;;  %v313_v34 = vadd.f32 %v312_v31, %v116_v22  ;;  %v406_v28 = vpop.permute.xlu0 %405 }
  0xf4   :  { %v352_v36 = vmax.f32 %v318_v30, 0.0 }
  0xf5   :  { %v351_v37 = vmax.f32 %v313_v34, 0.0  ;;  %v725_v38 = vpop.f32.mrb[12].mxu0  ;;  %815 = vmatprep.subr.bf16.mxu1 %v814_v33 }
  0xf6   :  { %v328_v39 = vadd.f32 %v725_v38, %v131_v32  ;;  %v322_v40 = vpop.f32.mrb[13].mxu0  ;;  %817 = vmatpush3.bf16.msra.mxu1 %v814_v33 }
  0xf7   :  { %v818_v41 = vpack.c.bf16 %v352_v36, %v351_v37  ;;  %v323_v42 = vadd.f32 %v322_v40, %v126_v35  ;;  %v526_v36 = vld [vmem:[%s1113_s5] sm:$0x1]  ;;  %v533_v37 = vlaneseq  ;;  %v531_v40 = vpop.permute.xlu0 %530  ;;  %s854_s5 = scalar_lea.vmem %s625_s24, 16 }
  0xf8   :  { %v354_v43 = vmax.f32 %v328_v39, 0.0  ;;  %p855_p0 = scmp.ne.s32.totalorder %s625_s24, %s854_s5  ;;  %p860_p2 = scmp.lt.s32.totalorder %s858_s2, %s854_s5 }
  0xf9   :  { %v353_v45 = vmax.f32 %v323_v42, 0.0  ;;  %v728_v46 = vpop.f32.mrb[14].mxu0  ;;  %819 = vmatprep.subr.bf16.mxu1 %v818_v41  ;;  %v534_v38 = vshrl.u32 %v533_v37, 7 }
  0xfa   :  { %v338_v48 = vadd.f32 %v728_v46, %v141_v44  ;;  %v332_v49 = vpop.f32.mrb[15].mxu0  ;;  %821 = vmatpush3.bf16.msra.mxu1 %v818_v41  ;;  %p861_p3 = por %p860_p2, %p859_p1 }
  0xfb   :  { %v822_v50 = vpack.c.bf16 %v354_v43, %v353_v45  ;;  %v333_v51 = vadd.f32 %v332_v49, %v136_v47  ;;  %v535_v39 = vsub.s32 0, %v534_v38 }
  0xfc   :  { %v356_v52 = vmax.f32 %v338_v48, 0.0  ;;  %p862_p4 = pnand %p861_p3, %p855_p0 }
  0xfd   :  { %v355_v53 = vmax.f32 %v333_v51, 0.0  ;;  %823 = vmatprep.subr.bf16.mxu1 %v822_v50  ;;  %v536_v41 = vrot.slane %v531_v40, %v535_v39 }
  0xfe   :  { %825 = vmatpush3.bf16.msra.mxu1 %v822_v50 }
  0xff   :  { %v826_v54 = vpack.c.bf16 %v356_v52, %v355_v53 }
 0x101   :  { %827 = vmatprep.subr.bf16.mxu1 %v826_v54 }
 0x102   :  { %829 = vmatpush3.bf16.msra.mxu1 %v826_v54 }
 0x105   :  { %762 = vmatmul.mubr.f32.vlgmr.msra.gmra.mrb[0].mxu1 %v358_v55 }
 0x106   :  { %764 = vmatprep.mubr.f32.mxu1 %v359_v56 }
 0x109   :  { %765 = vmatmul.mubr.f32.gmra.mrb[2].mxu1 %v360_v57 }
 0x10a   :  { %767 = vmatprep.mubr.f32.mxu1 %v361_v58 }
 0x10d   :  { %768 = vmatmul.mubr.f32.gmra.mrb[4].mxu1 %v362_v59 }
 0x10e   :  { %770 = vmatprep.mubr.f32.mxu1 %v363_v60 }
 0x111   :  { %771 = vmatmul.mubr.f32.gmra.mrb[6].mxu1 %v364_v61 }
 0x1d8   :  { %v763_v3 = vpop.f32.mrb[0].mxu1 }
 0x1d9   :  { %v485_v5 = vadd.f32 %v763_v3, %v381_v0  ;;  %v479_v6 = vpop.f32.mrb[1].mxu1 }
 0x1da   :  { %v480_v7 = vadd.f32 %v479_v6, %v376_v1 }
 0x1db   :  { %v519_v8 = vmax.f32 %v485_v5, 0.0 }
 0x1dc   :  { %v518_v9 = vmax.f32 %v480_v7, 0.0  ;;  %v766_v10 = vpop.f32.mrb[2].mxu1 }
 0x1dd   :  { %v495_v11 = vadd.f32 %v766_v10, %v391_v2  ;;  %v489_v12 = vpop.f32.mrb[3].mxu1 }
 0x1de   :  { %v831_v14 = vpack.c.bf16 %v519_v8, %v518_v9  ;;  %v490_v15 = vadd.f32 %v489_v12, %v386_v4 }
 0x1df   :  { %v521_v17 = vmax.f32 %v495_v11, 0.0 }
 0x1e0   :  { %v520_v18 = vmax.f32 %v490_v15, 0.0  ;;  %v769_v19 = vpop.f32.mrb[4].mxu1  ;;  %832 = vmatpush3.bf16.msra.mxu0 %v831_v14 }
 0x1e1   :  { %v505_v20 = vadd.f32 %v769_v19, %v401_v13  ;;  %v499_v21 = vpop.f32.mrb[5].mxu1  ;;  %833 = vmatprep.subr.bf16.mxu0 %v880_v62 }
 0x1e2   :  { %v834_v22 = vpack.c.bf16 %v521_v17, %v520_v18  ;;  %v500_v23 = vadd.f32 %v499_v21, %v396_v16 }
 0x1e3   :  { %v523_v24 = vmax.f32 %v505_v20, 0.0 }
 0x1e4   :  { %v522_v26 = vmax.f32 %v500_v23, 0.0  ;;  %v772_v27 = vpop.f32.mrb[6].mxu1  ;;  %835 = vmatpush3.bf16.msra.mxu0 %v834_v22 }
 0x1e5   :  { %v515_v29 = vadd.f32 %v772_v27, %v411_v25  ;;  %v509_v30 = vpop.f32.mrb[7].mxu1  ;;  %836 = vmatprep.subr.bf16.mxu0 %v880_v62 }
 0x1e6   :  { %v837_v31 = vpack.c.bf16 %v523_v24, %v522_v26  ;;  %v510_v32 = vadd.f32 %v509_v30, %v406_v28 }
 0x1e7   :  { %v525_v33 = vmax.f32 %v515_v29, 0.0 }
 0x1e8   :  { %v524_v34 = vmax.f32 %v510_v32, 0.0  ;;  %838 = vmatpush3.bf16.msra.mxu0 %v837_v31 }
 0x1e9   :  { %839 = vmatprep.subr.bf16.mxu0 %v880_v62 }
 0x1ea   :  { %v840_v35 = vpack.c.bf16 %v525_v33, %v524_v34 }
 0x1ec   :  { %841 = vmatpush3.bf16.msra.mxu0 %v840_v35 }
 0x1ef   :  { %790 = vmatmul.mubr.msk.f32.vlgmr.msra.gmra.mrb[16].mxu0 %vm537_vm5, %v526_v36 }
 0x2c2   :  { %v607_v42 = vpop.f32.mrb[16].mxu0 }
 0x2c3   :  { %v608_v43 = vadd.f32 %v607_v42, %v536_v41  ;;  %v791_v44 = vpop.f32.mrb[17].mxu0 }
 0x2c5   :  { %v611_v45 = vsub.f32 0.0, %v608_v43 }
 0x2c7   :  { %v612_v46 = vmul.f32 1.442695, %v611_v45 }
 0x2c9   :  { %850 = vpow2.f32 %v612_v46 }
 0x2d3   :  { %v851_v47 = vpop.eup %850 }
 0x2d4   :  { %v614_v48 = vadd.f32 1.0, %v851_v47 }
 0x2d6   :  { %852 = vrcp.f32 %v614_v48 }
 0x2e0   :  { %v853_v49 = vpop.eup %852 }
 0x2e1   :  { %617 = vst [vmem:[#allocation3] sm:$0x1] %v853_v49 }
 0x2e2   :  { %865 = shalt.err (!%p862_p4)
}
 0x2e3   :  { %s866_s27 = scalar_lea.hbm %s1115_s7, 16 }
 0x2e4   :  { %p867_p5 = scmp.ne.s32.totalorder %s1115_s7, %s866_s27  ;;  %p870_p6 = scmp.lt.u32.totalorder %s866_s27, %s1115_s7 }
 0x2e6   :  { %p872_p7 = pnand %p870_p6, %p867_p5 }
 0x2e8   :  { %875 = shalt.err (!%p872_p7)
}
 0x2e9   :  { %627 = dma.vmem_to_hbm [thread:$0]  %s625_s24, 16, %s1115_s7, [#allocation4]  }
 0x2ea   :  { %876 = dma.done.wait [#allocation4], 16  }
 0x2eb   :  { %877 = vsyncadd [#allocation4], 4294967280 }
 0x2ec   :  { %631 = vsyncpa [#allocation4], 1 }

</bundles_post_ra>
